<compile_context>
chip_gen: v5e
topology: v5e:2x2
jax: 0.10.0
libtpu: 0.0.40
codegen_flags: <defaults>
</compile_context>

<pallas_src>
import functools
from typing import Any, NamedTuple, Tuple

import jax
import jax.numpy as jnp
from jax.experimental import pallas as pl
from jax.experimental.pallas import tpu as pltpu

LANE = 128                      # last block dim must be a multiple of this
_FUSED_VMEM_BUDGET = 48 << 20   # conservative: below v7x's 64 MiB physical VMEM


def _round_up(x, m):
    return ((x + m - 1) // m) * m


def _sublane_granule(dtype):
    # rows packed per vreg sublane group: f32 -> 8, bf16 -> 16, int8/fp8 -> 32
    return {1: 32, 2: 16}.get(jnp.dtype(dtype).itemsize, 8)


class PreparedMLP(NamedTuple):
    params: Tuple            # ((w_pad [Kp,Np] cdt, b_pad [1,Np] f32), ...)
    dims: Tuple[int, ...]    # original feature dims (in, h1, ..., out)
    dims_p: Tuple[int, ...]  # dims rounded up to 128 lanes
    compute_dtype: Any


def prepare_params(params, compute_dtype=jnp.bfloat16):
    """Pad/cast weights+biases once (hoisted out of the per-call hot path).

    params: list of (w, b) with w stored as [in_features, out_features]
            (pre-transposed vs. PyTorch), so y = x @ w + b.
    """
    dims = tuple([params[0][0].shape[0]] + [w.shape[1] for (w, _) in params])
    dims_p = tuple(_round_up(d, LANE) for d in dims)
    prepped = []
    for l, (w, b) in enumerate(params):
        k_l, n_l = w.shape
        kp, np_ = dims_p[l], dims_p[l + 1]
        w_p = jnp.pad(w, ((0, kp - k_l), (0, np_ - n_l))).astype(compute_dtype)
        # bias stays f32: the bias add / ReLU are done in f32 in the kernels
        b_p = jnp.pad(b, ((0, np_ - n_l),)).reshape(1, np_).astype(jnp.float32)
        prepped.append((w_p, b_p))
    return PreparedMLP(tuple(prepped), dims, dims_p, jnp.dtype(compute_dtype))


def _resident_spec(shape):
    """Constant-index, single-buffered BlockSpec for a VMEM-resident operand."""
    imap = lambda i: (0,) * len(shape)
    try:
        # Constant index map => double-buffering never overlaps anything;
        # single-buffer to halve the resident weight/bias VMEM footprint.
        return pl.BlockSpec(shape, imap, pipeline_mode=pl.Buffered(1))
    except (TypeError, AttributeError):
        return pl.BlockSpec(shape, imap)


# ---------------------------------------------------------------------------
# Fully-fused path: whole MLP in one pallas_call, weights resident in VMEM.
# ---------------------------------------------------------------------------
def _fused_mlp_kernel(*refs, num_layers):
    """refs = (x_ref, w_0, b_0, ..., w_{L-1}, b_{L-1}, o_ref)."""
    x_ref = refs[0]
    o_ref = refs[-1]
    h = x_ref[...]
    for l in range(num_layers):
        w_ref = refs[1 + 2 * l]
        b_ref = refs[2 + 2 * l]
        h = jnp.dot(h.astype(w_ref.dtype), w_ref[...],
                    preferred_element_type=jnp.float32)
        h = h + b_ref[...].astype(jnp.float32)
        if l < num_layers - 1:
            h = jnp.maximum(h, 0.0)          # ReLU on hidden layers only
    o_ref[...] = h.astype(o_ref.dtype)


def _mlp_forward_fused(x, prep, *, tm, m_pad, vmem_limit):
    M, K = x.shape
    cdt = prep.compute_dtype
    dims, dims_p = prep.dims, prep.dims_p
    num_layers = len(prep.params)
    out_dim = dims[-1]
    out_dtype = x.dtype
    kp0 = dims_p[0]

    # Skip pad/cast of the activations when they are already in shape/dtype.
    if m_pad == M and kp0 == K and x.dtype == cdt:
        x_p = x
    else:
        x_p = jnp.pad(x, ((0, m_pad - M), (0, kp0 - K))).astype(cdt)

    flat_inputs = [x_p]
    in_specs = [pl.BlockSpec((tm, kp0), lambda i: (i, 0))]
    for (w_p, b_p) in prep.params:
        flat_inputs += [w_p, b_p]
        in_specs += [_resident_spec(w_p.shape), _resident_spec(b_p.shape)]

    flops = 2 * M * sum(dims[l] * dims[l + 1] for l in range(num_layers))
    bytes_accessed = (
        M * K * x.dtype.itemsize
        + sum(w.size * w.dtype.itemsize + b.size * b.dtype.itemsize
              for (w, b) in prep.params)
        + M * out_dim * jnp.dtype(out_dtype).itemsize)

    out_p = pl.pallas_call(
        functools.partial(_fused_mlp_kernel, num_layers=num_layers),
        out_shape=jax.ShapeDtypeStruct((m_pad, dims_p[-1]), out_dtype),
        grid_spec=pltpu.PrefetchScalarGridSpec(
            num_scalar_prefetch=0,
            grid=(m_pad // tm,),
            in_specs=in_specs,
            out_specs=pl.BlockSpec((tm, dims_p[-1]), lambda i: (i, 0)),
        ),
        compiler_params=pltpu.CompilerParams(
            dimension_semantics=("parallel",),
            vmem_limit_bytes=int(vmem_limit),
        ),
        cost_estimate=pl.CostEstimate(
            flops=int(flops),
            transcendentals=0,
            bytes_accessed=int(bytes_accessed),
        ),
    )(*flat_inputs)

    if m_pad == M and dims_p[-1] == out_dim:
        return out_p
    return out_p[:M, :out_dim]


# ---------------------------------------------------------------------------
# Fallback path for wide MLPs: per-layer K/N-tiled linear+bias(+ReLU) kernel.
# ---------------------------------------------------------------------------
def _linear_kernel(x_ref, w_ref, b_ref, o_ref, acc_ref, *, apply_relu):
    @pl.when(pl.program_id(2) == 0)
    def _():
        acc_ref[...] = jnp.zeros_like(acc_ref)

    acc_ref[...] += jnp.dot(x_ref[...], w_ref[...],
                            preferred_element_type=jnp.float32)

    @pl.when(pl.program_id(2) == pl.num_programs(2) - 1)
    def _():
        h = acc_ref[...] + b_ref[...].astype(jnp.float32)
        if apply_relu:
            h = jnp.maximum(h, 0.0)
        o_ref[...] = h.astype(o_ref.dtype)


def _pick_tile(dim_p, preferred):
    t = min(preferred, dim_p)
    while dim_p % t != 0:      # dim_p is a multiple of 128 -> terminates at 128
        t -= LANE
    return t


def _pallas_linear(x_p, w_p, b_p, *, apply_relu, out_dtype, tm, tn, tk):
    m_pad, kp = x_p.shape
    _, np_ = w_p.shape
    flops = 2 * m_pad * kp * np_
    bytes_accessed = (x_p.size * x_p.dtype.itemsize
                      + w_p.size * w_p.dtype.itemsize
                      + b_p.size * b_p.dtype.itemsize
                      + m_pad * np_ * jnp.dtype(out_dtype).itemsize)
    return pl.pallas_call(
        functools.partial(_linear_kernel, apply_relu=apply_relu),
        out_shape=jax.ShapeDtypeStruct((m_pad, np_), out_dtype),
        grid_spec=pltpu.PrefetchScalarGridSpec(
            num_scalar_prefetch=0,
            grid=(m_pad // tm, np_ // tn, kp // tk),
            in_specs=[
                pl.BlockSpec((tm, tk), lambda i, j, k: (i, k)),
                pl.BlockSpec((tk, tn), lambda i, j, k: (k, j)),
                pl.BlockSpec((1, tn), lambda i, j, k: (0, j)),
            ],
            out_specs=pl.BlockSpec((tm, tn), lambda i, j, k: (i, j)),
            scratch_shapes=[pltpu.VMEM((tm, tn), jnp.float32)],
        ),
        compiler_params=pltpu.CompilerParams(
            dimension_semantics=("parallel", "parallel", "arbitrary"),
        ),
        cost_estimate=pl.CostEstimate(
            flops=int(flops), transcendentals=0,
            bytes_accessed=int(bytes_accessed)),
    )(x_p, w_p, b_p)


def _mlp_forward_layered(x, prep, *, block_m=256):
    M, K = x.shape
    cdt = prep.compute_dtype
    dims_p = prep.dims_p
    num_layers = len(prep.params)
    out_dim = prep.dims[-1]
    out_dtype = x.dtype

    granule = _sublane_granule(cdt)
    tm = min(block_m, _round_up(M, granule))
    m_pad = _round_up(M, tm)
    kp0 = dims_p[0]

    if m_pad == M and kp0 == K and x.dtype == cdt:
        h = x
    else:
        h = jnp.pad(x, ((0, m_pad - M), (0, kp0 - K))).astype(cdt)

    for l, (w_p, b_p) in enumerate(prep.params):
        last = (l == num_layers - 1)
        h = _pallas_linear(
            h, w_p, b_p,
            apply_relu=not last,
            out_dtype=(out_dtype if last else cdt),
            tm=tm,
            tn=_pick_tile(dims_p[l + 1], 512),
            tk=_pick_tile(dims_p[l], 512),
        )

    if m_pad == M and dims_p[-1] == out_dim:
        return h
    return h[:M, :out_dim]


# ---------------------------------------------------------------------------
# Public forward
# ---------------------------------------------------------------------------
def mlp_forward(x, prep, *, block_m=512, force_layered=False):
    """MLP forward; `prep` comes from prepare_params()."""
    M, K = x.shape
    assert K == prep.dims[0], "input feature dim mismatch"
    cdt = prep.compute_dtype
    dims_p = prep.dims_p
    out_dtype = x.dtype

    granule = _sublane_granule(cdt)
    if M > granule:
        # Cap the tile at ceil(M/2) so the "parallel" batch grid has >= 2
        # steps -> both v7x TensorCores get work for medium batches.
        tm_cap = _round_up(-(-M // 2), granule)
    else:
        tm_cap = granule
    tm = min(block_m, tm_cap)
    m_pad = _round_up(M, tm)

    # VMEM footprint of the fully-fused, weights-resident kernel:
    # single-buffered weights + biases + double-buffered x/out tiles
    # + in-flight f32 intermediates, with ~25% headroom.
    wb = sum(w.size * w.dtype.itemsize for (w, _) in prep.params)
    bb = sum(8 * b.shape[-1] * b.dtype.itemsize for (_, b) in prep.params)
    io = (2 * tm * dims_p[0] * jnp.dtype(cdt).itemsize
          + 2 * tm * dims_p[-1] * jnp.dtype(out_dtype).itemsize)
    interm = 2 * tm * max(dims_p) * 4
    needed = int(1.25 * (wb + bb + io + interm)) + (2 << 20)

    if force_layered or needed > _FUSED_VMEM_BUDGET:
        # Resident weights would not fit scoped VMEM: tiled per-layer path.
        return _mlp_forward_layered(x, prep, block_m=min(block_m, 256))

    vmem_limit = min(max(needed, 16 << 20), _FUSED_VMEM_BUDGET)
    return _mlp_forward_fused(x, prep, tm=tm, m_pad=m_pad,
                              vmem_limit=vmem_limit)


def init_mlp_params(key, inputs, layer_dims, dtype=jnp.float32):
    """Deterministic init mimicking nn.Linear default (uniform +-1/sqrt(fan_in))."""
    params = []
    fan_in = inputs
    for out_dim in layer_dims:
        key, kw, kb = jax.random.split(key, 3)
        bound = 1.0 / (fan_in ** 0.5)
        # stored as [in, out] (pre-transposed relative to PyTorch's [out, in])
        w = jax.random.uniform(kw, (fan_in, out_dim), dtype, -bound, bound)
        b = jax.random.uniform(kb, (out_dim,), dtype, -bound, bound)
        params.append((w, b))
        fan_in = out_dim
    return params


def _reference_mlp(x, params):
    h = x
    for w, b in params[:-1]:
        h = jnp.maximum(
            jnp.dot(h, w, precision=jax.lax.Precision.HIGHEST) + b, 0.0)
    w, b = params[-1]
    return jnp.dot(h, w, precision=jax.lax.Precision.HIGHEST) + b


if __name__ == "__main__":
    key = jax.random.PRNGKey(0)
    kx, kp = jax.random.split(key)

    batch = 8
    inputs = 32
    layer_dims = [64, 32, 16]   # two hidden (Linear+ReLU) layers + output Linear

    x = jax.random.normal(kx, (batch, inputs), jnp.float32)
    params = init_mlp_params(kp, inputs, layer_dims)
    ref = _reference_mlp(x, params)

    # Default path: bf16 operands, f32 accumulation, fully fused kernel.
    prep_bf16 = prepare_params(params, compute_dtype=jnp.bfloat16)
    out = jax.block_until_ready(mlp_forward(x, prep_bf16))
    assert out.shape == (batch, layer_dims[-1])
    assert jnp.allclose(out, ref, atol=3e-2, rtol=3e-2)

    # f32-operand fused path (tighter numerical check).
    prep_f32 = prepare_params(params, compute_dtype=jnp.float32)
    out_f32 = jax.block_until_ready(mlp_forward(x, prep_f32))
    assert jnp.allclose(out_f32, ref, atol=2e-3, rtol=2e-3)

    # Exercise the K/N-tiled per-layer fallback (used when weights > VMEM).
    out_layered = jax.block_until_ready(
        mlp_forward(x, prep_bf16, force_layered=True))
    assert jnp.allclose(out_layered, ref, atol=3e-2, rtol=3e-2)

    print("KERNEL_OK")
</pallas_src>

<mosaic_0001>
module attributes {stable_mosaic.version = 11 : i64} {
  func.func @_fused_mlp_kernel(%arg0: i32, %arg1: memref<16x128xbf16, #tpu.memory_space<vmem>>, %arg2: memref<128x128xbf16, #tpu.memory_space<vmem>>, %arg3: memref<1x128xf32, #tpu.memory_space<vmem>>, %arg4: memref<128x128xbf16, #tpu.memory_space<vmem>>, %arg5: memref<1x128xf32, #tpu.memory_space<vmem>>, %arg6: memref<128x128xbf16, #tpu.memory_space<vmem>>, %arg7: memref<1x128xf32, #tpu.memory_space<vmem>>, %arg8: memref<16x128xf32, #tpu.memory_space<vmem>>) attributes {dimension_semantics = [#tpu.dimension_semantics<parallel>], iteration_bounds = array<i64: 1>, scalar_prefetch = 0 : i64, scratch_operands = 0 : i64, tpu.core_type = #tpu.core_type<tc>, window_params = [{transform_indices = @transform_0, window_bounds = array<i64: 16, 128>}, {pipeline_mode = #tpu.pipeline_mode<synchronous>, transform_indices = @transform_1, window_bounds = array<i64: 128, 128>}, {pipeline_mode = #tpu.pipeline_mode<synchronous>, transform_indices = @transform_2, window_bounds = array<i64: 1, 128>}, {pipeline_mode = #tpu.pipeline_mode<synchronous>, transform_indices = @transform_3, window_bounds = array<i64: 128, 128>}, {pipeline_mode = #tpu.pipeline_mode<synchronous>, transform_indices = @transform_4, window_bounds = array<i64: 1, 128>}, {pipeline_mode = #tpu.pipeline_mode<synchronous>, transform_indices = @transform_5, window_bounds = array<i64: 128, 128>}, {pipeline_mode = #tpu.pipeline_mode<synchronous>, transform_indices = @transform_6, window_bounds = array<i64: 1, 128>}, {transform_indices = @transform_7, window_bounds = array<i64: 16, 128>}]} {
    %c0 = arith.constant 0 : index
    %c0_0 = arith.constant 0 : index
    %0 = vector.load %arg1[%c0, %c0_0] : memref<16x128xbf16, #tpu.memory_space<vmem>>, vector<16x128xbf16>
    %c0_1 = arith.constant 0 : index
    %c0_2 = arith.constant 0 : index
    %1 = vector.load %arg2[%c0_1, %c0_2] : memref<128x128xbf16, #tpu.memory_space<vmem>>, vector<128x128xbf16>
    %cst = arith.constant dense<0.000000e+00> : vector<16x128xf32>
    %2 = tpu.matmul %0, %1, %cst {dimension_numbers = #tpu.dot_dimension_numbers<[1], [0], [0], [1], [0, 0, 1, 1], [], []>} : vector<16x128xbf16>, vector<128x128xbf16>, vector<16x128xf32> -> vector<16x128xf32>
    %c0_3 = arith.constant 0 : index
    %c0_4 = arith.constant 0 : index
    %3 = vector.load %arg3[%c0_3, %c0_4] : memref<1x128xf32, #tpu.memory_space<vmem>>, vector<1x128xf32>
    %4 = vector.broadcast %3 : vector<1x128xf32> to vector<16x128xf32>
    %5 = arith.addf %2, %4 : vector<16x128xf32>
    %cst_5 = arith.constant 0.000000e+00 : f32
    %6 = vector.broadcast %cst_5 : f32 to vector<16x128xf32>
    %7 = arith.maximumf %5, %6 : vector<16x128xf32>
    %8 = arith.truncf %7 : vector<16x128xf32> to vector<16x128xbf16>
    %c0_6 = arith.constant 0 : index
    %c0_7 = arith.constant 0 : index
    %9 = vector.load %arg4[%c0_6, %c0_7] : memref<128x128xbf16, #tpu.memory_space<vmem>>, vector<128x128xbf16>
    %cst_8 = arith.constant dense<0.000000e+00> : vector<16x128xf32>
    %10 = tpu.matmul %8, %9, %cst_8 {dimension_numbers = #tpu.dot_dimension_numbers<[1], [0], [0], [1], [0, 0, 1, 1], [], []>} : vector<16x128xbf16>, vector<128x128xbf16>, vector<16x128xf32> -> vector<16x128xf32>
    %c0_9 = arith.constant 0 : index
    %c0_10 = arith.constant 0 : index
    %11 = vector.load %arg5[%c0_9, %c0_10] : memref<1x128xf32, #tpu.memory_space<vmem>>, vector<1x128xf32>
    %12 = vector.broadcast %11 : vector<1x128xf32> to vector<16x128xf32>
    %13 = arith.addf %10, %12 : vector<16x128xf32>
    %cst_11 = arith.constant 0.000000e+00 : f32
    %14 = vector.broadcast %cst_11 : f32 to vector<16x128xf32>
    %15 = arith.maximumf %13, %14 : vector<16x128xf32>
    %16 = arith.truncf %15 : vector<16x128xf32> to vector<16x128xbf16>
    %c0_12 = arith.constant 0 : index
    %c0_13 = arith.constant 0 : index
    %17 = vector.load %arg6[%c0_12, %c0_13] : memref<128x128xbf16, #tpu.memory_space<vmem>>, vector<128x128xbf16>
    %cst_14 = arith.constant dense<0.000000e+00> : vector<16x128xf32>
    %18 = tpu.matmul %16, %17, %cst_14 {dimension_numbers = #tpu.dot_dimension_numbers<[1], [0], [0], [1], [0, 0, 1, 1], [], []>} : vector<16x128xbf16>, vector<128x128xbf16>, vector<16x128xf32> -> vector<16x128xf32>
    %c0_15 = arith.constant 0 : index
    %c0_16 = arith.constant 0 : index
    %19 = vector.load %arg7[%c0_15, %c0_16] : memref<1x128xf32, #tpu.memory_space<vmem>>, vector<1x128xf32>
    %20 = vector.broadcast %19 : vector<1x128xf32> to vector<16x128xf32>
    %21 = arith.addf %18, %20 : vector<16x128xf32>
    %c0_17 = arith.constant 0 : index
    %c0_18 = arith.constant 0 : index
    %22 = vector.load %arg8[%c0_17, %c0_18] : memref<16x128xf32, #tpu.memory_space<vmem>>, vector<16x128xf32>
    tpu.vector_store %arg8[%c0_17, %c0_18], %21 {strides = array<i32>} : memref<16x128xf32, #tpu.memory_space<vmem>>, vector<16x128xf32>,
    return
  }
  func.func @transform_0(%arg0: i32) -> (i32, i32) {
    %c0_i32 = arith.constant 0 : i32
    %c0_i32_0 = arith.constant 0 : i32
    return %arg0, %c0_i32 : i32, i32
  }
  func.func @transform_1(%arg0: i32) -> (i32, i32) {
    %c0_i32 = arith.constant 0 : i32
    %c0_i32_0 = arith.constant 0 : i32
    %c0_i32_1 = arith.constant 0 : i32
    return %c0_i32, %c0_i32_0 : i32, i32
  }
  func.func @transform_2(%arg0: i32) -> (i32, i32) {
    %c0_i32 = arith.constant 0 : i32
    %c0_i32_0 = arith.constant 0 : i32
    %c0_i32_1 = arith.constant 0 : i32
    return %c0_i32, %c0_i32_0 : i32, i32
  }
  func.func @transform_3(%arg0: i32) -> (i32, i32) {
    %c0_i32 = arith.constant 0 : i32
    %c0_i32_0 = arith.constant 0 : i32
    %c0_i32_1 = arith.constant 0 : i32
    return %c0_i32, %c0_i32_0 : i32, i32
  }
  func.func @transform_4(%arg0: i32) -> (i32, i32) {
    %c0_i32 = arith.constant 0 : i32
    %c0_i32_0 = arith.constant 0 : i32
    %c0_i32_1 = arith.constant 0 : i32
    return %c0_i32, %c0_i32_0 : i32, i32
  }
  func.func @transform_5(%arg0: i32) -> (i32, i32) {
    %c0_i32 = arith.constant 0 : i32
    %c0_i32_0 = arith.constant 0 : i32
    %c0_i32_1 = arith.constant 0 : i32
    return %c0_i32, %c0_i32_0 : i32, i32
  }
  func.func @transform_6(%arg0: i32) -> (i32, i32) {
    %c0_i32 = arith.constant 0 : i32
    %c0_i32_0 = arith.constant 0 : i32
    %c0_i32_1 = arith.constant 0 : i32
    return %c0_i32, %c0_i32_0 : i32, i32
  }
  func.func @transform_7(%arg0: i32) -> (i32, i32) {
    %c0_i32 = arith.constant 0 : i32
    %c0_i32_0 = arith.constant 0 : i32
    return %arg0, %c0_i32 : i32, i32
  }
}

</mosaic_0001>

<bundles_post_ra>
// kernel: tpu_custom_call.1
= control target key start
LH: loop header
LB: loop body
LE: loop exit
PB: predicated region body
PF: predicated region fallthrough
CT: control target
= control target key end

     0   :  { %12 = vsyncpa [#allocation3], 0  ;;  %s711_s0 = inlined_call_operand.hbm [shape: bf16[16,128], index: 0, kind: input, shape index: {}]   ;;  %s712_s1 = inlined_call_operand.hbm [shape: bf16[128,128], index: 1, kind: input, shape index: {}]   ;;  %s713_s2 = inlined_call_operand.vmem [shape: f32[1,128], index: 2, kind: input, shape index: {}]   ;;  %s714_s3 = inlined_call_operand.hbm [shape: bf16[128,128], index: 3, kind: input, shape index: {}]   ;;  %s715_s4 = inlined_call_operand.vmem [shape: f32[1,128], index: 4, kind: input, shape index: {}]   ;;  %s716_s5 = inlined_call_operand.hbm [shape: bf16[128,128], index: 5, kind: input, shape index: {}]   ;;  %s717_s6 = inlined_call_operand.vmem [shape: f32[1,128], index: 6, kind: input, shape index: {}]   ;;  %s718_s7 = inlined_call_operand.hbm [shape: f32[16,128], index: 7, kind: output, shape index: {}]  }
   0x1   :  { %13 = vsyncpa [#allocation6], 0 }
   0x2   :  { %14 = vsyncpa [#allocation9], 0 }
   0x3   :  { %15 = vsyncpa [#allocation4], 0  ;;  %s33_s26 = sshll.u32 %s712_s1, 4  ;;  %s638_s27 = smov [#allocation5]   ;;  %s34_s26 = int_to_ptr.hbm [resolvable:$true] %s33_s26 }
   0x4   :  { %s35_s28 = sshll.u32 %s638_s27, 4  ;;  %s20_s8 = sshll.u32 %s711_s0, 4  ;;  %s36_s28 = int_to_ptr.vmem [resolvable:$true] %s35_s28  ;;  %s21_s8 = int_to_ptr.hbm [resolvable:$true] %s20_s8 }
   0x5   :  { %s639_s9 = smov 64   ;;  %s640_s10 = smov 4  }
   0x6   :  { %41 = dma.hbm_to_vmem [thread:$0]  %s34_s26, 1024, %s36_s28, [#allocation6], %s639_s9, %s639_s9, %s640_s10  }
   0x7   :  { %s641_s11 = smov [#allocation2]   ;;  %s48_s15 = sshll.u32 %s714_s3, 4  ;;  %s49_s15 = int_to_ptr.hbm [resolvable:$true] %s48_s15 }
   0x8   :  { %s22_s12 = sshll.u32 %s641_s11, 4  ;;  %s63_s17 = sshll.u32 %s716_s5, 4  ;;  %s23_s12 = int_to_ptr.vmem [resolvable:$true] %s22_s12  ;;  %s64_s17 = int_to_ptr.hbm [resolvable:$true] %s63_s17 }
   0x9   :  { %28 = dma.hbm_to_vmem [thread:$0]  %s21_s8, 128, %s23_s12, [#allocation3], %s639_s9, %s639_s9, %s640_s10  }
   0xa   :  { %s642_s18 = smov [#allocation7]   ;;  %s643_s0 = smov [#allocation8]  }
   0xb   :  { %s50_s19 = sshll.u32 %s642_s18, 4  ;;  %s65_s20 = sshll.u32 %s643_s0, 4  ;;  %s51_s19 = int_to_ptr.vmem [resolvable:$true] %s50_s19  ;;  %s66_s20 = int_to_ptr.vmem [resolvable:$true] %s65_s20 }
   0xc   :  { %56 = dma.hbm_to_vmem [thread:$0]  %s49_s15, 1024, %s51_s19, [#allocation6], %s639_s9, %s639_s9, %s640_s10  }
   0xd   :  { %71 = dma.hbm_to_vmem [thread:$0]  %s64_s17, 1024, %s66_s20, [#allocation9], %s639_s9, %s639_s9, %s640_s10  }
   0xe   :  { %630 = dma.done.wait [#allocation3], 128  }
   0xf   :  { %631 = vsyncadd [#allocation3], 4294967168 }
  0x10   :  { %632 = dma.done.wait [#allocation6], 2048  }
  0x11   :  { %633 = vsyncadd [#allocation6], 4294965248 }
  0x12   :  { %634 = dma.done.wait [#allocation9], 1024  }
  0x13   :  { %635 = vsyncadd [#allocation9], 4294966272  ;;  %v481_v0 = vld [vmem:[#allocation5 + $0x38] sm:$0xff]  ;;  %v480_v1 = vld [vmem:[#allocation5 + $0x30] sm:$0xff]  ;;  %s644_s24 = smov [#allocation10]   ;;  %s645_s28 = smov 128  }
  0x14   :  { %166 = vmatpush.bf16.msra.mxu0 %v481_v0  ;;  %v489_v2 = vld [vmem:[#allocation7 + $0x38] sm:$0xff]  ;;  %v488_v3 = vld [vmem:[#allocation7 + $0x30] sm:$0xff]  ;;  %v479_v4 = vld [vmem:[#allocation5 + $0x28] sm:$0xff]  ;;  %s356_s25 = sshll.u32 %s644_s24, 4  ;;  %s646_s29 = smov 8   ;;  %s357_s25 = int_to_ptr.vmem [resolvable:$true] %s356_s25 }
  0x15   :  { %251 = vmatpush.bf16.msra.mxu1 %v489_v2  ;;  %v487_v5 = vld [vmem:[#allocation7 + $0x28] sm:$0xff]  ;;  %v478_v6 = vld [vmem:[#allocation5 + $0x20] sm:$0xff]  ;;  %v477_v8 = vld [vmem:[#allocation5 + $0x18] sm:$0xff] }
  0x16   :  { %v486_v7 = vld [vmem:[#allocation7 + $0x20] sm:$0xff]  ;;  %v476_v9 = vld [vmem:[#allocation5 + $0x10] sm:$0xff]  ;;  %v475_v10 = vld [vmem:[#allocation5 + $0x8] sm:$0xff] }
  0x17   :  { %v474_v11 = vld [vmem:[#allocation5] sm:$0xff]  ;;  %v473_v12 = vld [vmem:[#allocation2] sm:$0xff]  ;;  %v484_v14 = vld [vmem:[#allocation7 + $0x10] sm:$0xff] }
  0x18   :  { %167 = vmatpush.bf16.msra.mxu0 %v480_v1  ;;  %v485_v13 = vld [vmem:[#allocation7 + $0x18] sm:$0xff]  ;;  %v483_v15 = vld [vmem:[#allocation7 + $0x8] sm:$0xff]  ;;  %v482_v16 = vld [vmem:[#allocation7] sm:$0xff] }
  0x19   :  { %252 = vmatpush.bf16.msra.mxu1 %v488_v3  ;;  %v497_v17 = vld [vmem:[#allocation8 + $0x38] sm:$0xff]  ;;  %v496_v18 = vld [vmem:[#allocation8 + $0x30] sm:$0xff]  ;;  %v495_v19 = vld [vmem:[#allocation8 + $0x28] sm:$0xff] }
  0x1a   :  { %336 = vmatpush.bf16.msra.mxu2 %v497_v17  ;;  %v494_v20 = vld [vmem:[#allocation8 + $0x20] sm:$0xff]  ;;  %v507_v22 = vld [vmem:[%s713_s2] ss:$0 sm:$0xff]  ;;  %v492_v30 = vld [vmem:[#allocation8 + $0x10] sm:$0xff] }
  0x1b   :  { %v493_v29 = vld [vmem:[#allocation8 + $0x18] sm:$0xff]  ;;  %v491_v31 = vld [vmem:[#allocation8 + $0x8] sm:$0xff]  ;;  %v490_v32 = vld [vmem:[#allocation8] sm:$0xff] }
  0x1c   :  { %168 = vmatpush.bf16.msra.mxu0 %v479_v4  ;;  %v508_v34 = vld [vmem:[%s715_s4] ss:$0 sm:$0xff]  ;;  %s358_s4 = sshll.u32 %s718_s7, 4  ;;  %s359_s4 = int_to_ptr.hbm [resolvable:$true] %s358_s4 }
  0x1d   :  { %253 = vmatpush.bf16.msra.mxu1 %v487_v5  ;;  %v509_v41 = vld [vmem:[%s717_s6] ss:$0 sm:$0xff] }
  0x1e   :  { %337 = vmatpush.bf16.msra.mxu2 %v496_v18 }
  0x20   :  { %169 = vmatpush.bf16.msra.mxu0 %v478_v6 }
  0x21   :  { %254 = vmatpush.bf16.msra.mxu1 %v486_v7 }
  0x22   :  { %338 = vmatpush.bf16.msra.mxu2 %v495_v19 }
  0x24   :  { %170 = vmatpush.bf16.msra.mxu0 %v477_v8 }
  0x25   :  { %255 = vmatpush.bf16.msra.mxu1 %v485_v13 }
  0x26   :  { %339 = vmatpush.bf16.msra.mxu2 %v494_v20 }
  0x28   :  { %171 = vmatpush.bf16.msra.mxu0 %v476_v9 }
  0x29   :  { %256 = vmatpush.bf16.msra.mxu1 %v484_v14 }
  0x2a   :  { %340 = vmatpush.bf16.msra.mxu2 %v493_v29 }
  0x2c   :  { %172 = vmatpush.bf16.msra.mxu0 %v475_v10 }
  0x2d   :  { %257 = vmatpush.bf16.msra.mxu1 %v483_v15 }
  0x2e   :  { %341 = vmatpush.bf16.msra.mxu2 %v492_v30 }
  0x30   :  { %173 = vmatpush.bf16.msra.mxu0 %v474_v11 }
  0x31   :  { %258 = vmatpush.bf16.msra.mxu1 %v482_v16 }
  0x32   :  { %342 = vmatpush.bf16.msra.mxu2 %v491_v31 }
  0x33   :  { %174 = vmatmul.bf16.vlgmr.msra.gmra.mxu0 %v473_v12 }
  0x36   :  { %343 = vmatpush.bf16.msra.mxu2 %v490_v32 }
  0xb0   :  { %v175_v21 = vpop.f32.mrf.mxu0 }
  0xb1   :  { %v176_v23 = vadd.f32 %v507_v22, %v175_v21 }
  0xb3   :  { %v180_v26 = vmax.f32 %v176_v23, 0.0 }
  0xb8   :  { %v177_v24 = vpop.f32.mrf.mxu0 }
  0xb9   :  { %v178_v25 = vadd.f32 %v507_v22, %v177_v24 }
  0xbb   :  { %v181_v27 = vmax.f32 %v178_v25, 0.0 }
  0xbd   :  { %v182_v28 = vpack.c.bf16 %v181_v27, %v180_v26 }
  0xbf   :  { %259 = vmatmul.bf16.vlgmr.msra.gmra.mxu1 %v182_v28 }
 0x13c   :  { %v260_v33 = vpop.f32.mrf.mxu1 }
 0x13d   :  { %v261_v35 = vadd.f32 %v508_v34, %v260_v33 }
 0x13f   :  { %v265_v38 = vmax.f32 %v261_v35, 0.0 }
 0x144   :  { %v262_v36 = vpop.f32.mrf.mxu1 }
 0x145   :  { %v263_v37 = vadd.f32 %v508_v34, %v262_v36 }
 0x147   :  { %v266_v39 = vmax.f32 %v263_v37, 0.0 }
 0x149   :  { %v267_v40 = vpack.c.bf16 %v266_v39, %v265_v38 }
 0x14b   :  { %344 = vmatmul.bf16.vlgmr.msra.gmra.mxu2 %v267_v40 }
 0x1ce   :  { %v345_v42 = vpop.f32.mrf.mxu2 }
 0x1cf   :  { %v346_v43 = vadd.f32 %v509_v41, %v345_v42 }
 0x1d1   :  { %350 = vst [vmem:[#allocation10] sm:$0xff] %v346_v43 }
 0x1d6   :  { %v347_v44 = vpop.f32.mrf.mxu2 }
 0x1d7   :  { %v348_v45 = vadd.f32 %v509_v41, %v347_v44 }
 0x1d9   :  { %351 = vst [vmem:[#allocation10 + $0x8] sm:$0xff] %v348_v45 }
 0x1da   :  { %364 = dma.vmem_to_hbm [thread:$0]  %s357_s25, 256, %s359_s4, [#allocation4], %s645_s28, %s645_s28, %s646_s29  }
 0x1db   :  { %636 = dma.done.wait [#allocation4], 256  }
 0x1dc   :  { %637 = vsyncadd [#allocation4], 4294967040 }
 0x1dd   :  { %369 = vsyncpa [#allocation3], 1 }
 0x1de   :  { %370 = vsyncpa [#allocation6], 1 }
 0x1df   :  { %371 = vsyncpa [#allocation9], 1 }
 0x1e0   :  { %372 = vsyncpa [#allocation4], 1 }

</bundles_post_ra>
